<compile_context>
chip_gen: v6e
topology: v6e:2x2x1
jax: 0.10.0
libtpu: 0.0.40
codegen_flags: <defaults>
</compile_context>

<pallas_src>
import functools

import jax
import jax.numpy as jnp
from jax import lax
from jax.experimental import pallas as pl
from jax.experimental.pallas import tpu as pltpu


def _round_up(x, m):
    return ((x + m - 1) // m) * m


def _logistic_loss_kernel(x_ref, y_ref, w_ref, partial_ref, *,
                          n_total, n_classes, tn):
    i = pl.program_id(0)

    x = x_ref[...]                                   # (TN, D)      f32
    w = w_ref[...]                                   # (D, C_pad)   f32 (pre-transposed)
    y = y_ref[...]                                   # (TN, 1)      int32

    # logits[r, c] = X[r,:] . W[c,:]  -- MXU-native (tn,d) x (d,c_pad).
    logits = jnp.dot(x, w, preferred_element_type=jnp.float32)   # (TN, C_pad)

    cls_idx = lax.broadcasted_iota(jnp.int32, logits.shape, 1)   # (TN, C_pad)
    valid_cls = cls_idx < n_classes

    # Label term W[y_r,:] . X[r,:] via iota==y mask (no host one-hot).
    label_dot = jnp.sum(
        jnp.where(cls_idx == y, logits, 0.0), axis=-1, keepdims=True)   # (TN, 1)

    # logsumexp over *valid* classes of (-logits), numerically stable.
    # (-1e30 is a Python literal -> not a captured traced constant.)
    neg = jnp.where(valid_cls, -logits, -1e30)
    m = jnp.max(neg, axis=-1, keepdims=True)                            # (TN, 1)
    lse = jnp.log(jnp.sum(jnp.exp(neg - m), axis=-1, keepdims=True)) + m

    # Mask out-of-range rows (partial last block: OOB data is unspecified;
    # this select keeps any NaN/Inf there from propagating).
    row_idx = i * tn + lax.broadcasted_iota(jnp.int32, (tn, 1), 0)
    per_row = jnp.where(row_idx < n_total, label_dot + lse, 0.0)        # (TN, 1)

    tile_sum = jnp.sum(per_row)

    # Lane-dense per-tile partial (wrapper reads [:, 0, 0] and sums).
    partial_ref[...] = jnp.full(partial_ref.shape, tile_sum, dtype=jnp.float32)


def logistic_loss(x, w, w_init, y, *, tn=1024):
    """x: (N, D) f32, w/w_init: (C, D) f32, y: (N,) int -> scalar f32 loss."""
    n, d = x.shape
    c = w.shape[0]

    c_pad = _round_up(c, 128)
    tn = min(_round_up(tn, 8), _round_up(n, 8))
    num_tiles = pl.cdiv(n, tn)

    # X streamed as-is (no padded HBM copy). W transposed/padded once (tiny).
    x_f = x.astype(jnp.float32)
    w_t = jnp.zeros((d, c_pad), jnp.float32).at[:, :c].set(
        w.astype(jnp.float32).T)
    y_col = y.astype(jnp.int32).reshape(n, 1)

    # VMEM budget: double-buffered X tile + lane-padded label tile + W
    # (conservatively double-buffered) + output, plus headroom. Capped below
    # v7x's 64 MiB per-core physical VMEM.
    vmem_need = (2 * tn * d * 4            # X double buffer
                 + 2 * tn * 128 * 4        # labels (lane-padded int32)
                 + 2 * d * c_pad * 4       # resident W (conservative x2)
                 + 2 * 8 * 128 * 4)        # partial output
    vmem_limit = int(min(max(vmem_need + (8 << 20), 32 << 20), 56 << 20))

    kernel = functools.partial(
        _logistic_loss_kernel, n_total=n, n_classes=c, tn=tn)

    partials = pl.pallas_call(
        kernel,
        out_shape=jax.ShapeDtypeStruct((num_tiles, 8, 128), jnp.float32),
        grid=(num_tiles,),
        in_specs=[
            pl.BlockSpec((tn, d), lambda i: (i, 0)),       # X tile (pipelined)
            pl.BlockSpec((tn, 1), lambda i: (i, 0)),       # labels tile
            # W resident (constant index_map -> fetched once, reused).
            # TODO(synk): optionally pipeline_mode=pl.Buffered(1) to shave the
            # second W buffer if VMEM ever gets tight.
            pl.BlockSpec((d, c_pad), lambda i: (0, 0)),
        ],
        out_specs=pl.BlockSpec((1, 8, 128), lambda i: (i, 0, 0)),
        compiler_params=pltpu.CompilerParams(
            dimension_semantics=("parallel",),
            vmem_limit_bytes=vmem_limit,
        ),
        cost_estimate=pl.CostEstimate(
            flops=2 * n * d * c_pad,
            transcendentals=n * c_pad,
            bytes_accessed=(n * d * 4 + n * 4 + d * c_pad * 4
                            + num_tiles * 8 * 128 * 4),
        ),
    )(x_f, y_col, w_t)

    data_term = jnp.sum(partials[:, 0, 0]) / jnp.float32(n)
    # Regularizer is independent of X; compute once outside the tiled loop.
    w0 = w_init.astype(jnp.float32)
    reg = 0.001 * jnp.sqrt(jnp.sum(w0 * w0))
    return data_term + reg


def logistic_loss_ref(x, w, w_init, y):
    """Pure-JAX reference mirroring the PyTorch forward."""
    logits = x @ w.T                                              # (N, C)
    label_dot = jnp.take_along_axis(logits, y[:, None], axis=1)[:, 0]
    lse = jax.scipy.special.logsumexp(-logits, axis=-1)
    return jnp.mean(label_dot + lse) + 0.001 * jnp.sqrt(jnp.sum(w_init * w_init))


if __name__ == "__main__":
    # Small synthetic shapes consistent with the module (default weights are
    # (num_classes=20, num_features=2001); we shrink to C=4, D=32, N=8).
    N, D, C = 8, 32, 4
    key = jax.random.PRNGKey(0)
    kx, ky, kw = jax.random.split(key, 3)

    X = jax.random.normal(kx, (N, D), dtype=jnp.float32)
    Y = jax.random.randint(ky, (N,), 0, C, dtype=jnp.int32)
    # torch.rand -> uniform [0, 1); deterministic init, no checkpoint load.
    W_init = jax.random.uniform(kw, (C, D), dtype=jnp.float32)
    W = W_init  # evaluate the loss at the init weights (forward arg)

    loss = jax.block_until_ready(logistic_loss(X, W, W_init, Y))
    ref = jax.block_until_ready(logistic_loss_ref(X, W, W_init, Y))

    assert jnp.allclose(loss, ref, rtol=1e-5, atol=1e-5), (loss, ref)
    print("KERNEL_OK")
</pallas_src>

<mosaic_0001>
module attributes {stable_mosaic.version = 11 : i64} {
  func.func @_logistic_loss_kernel(%arg0: i32, %arg1: memref<8x32xf32, #tpu.memory_space<vmem>>, %arg2: memref<8x1xi32, #tpu.memory_space<vmem>>, %arg3: memref<32x128xf32, #tpu.memory_space<vmem>>, %arg4: memref<1x8x128xf32, #tpu.memory_space<vmem>>) attributes {dimension_semantics = [#tpu.dimension_semantics<parallel>], iteration_bounds = array<i64: 1>, scalar_prefetch = 0 : i64, scratch_operands = 0 : i64, tpu.core_type = #tpu.core_type<tc>, window_params = [{transform_indices = @transform_0, window_bounds = array<i64: 8, 32>}, {transform_indices = @transform_1, window_bounds = array<i64: 8, 1>}, {pipeline_mode = #tpu.pipeline_mode<synchronous>, transform_indices = @transform_2, window_bounds = array<i64: 32, 128>}, {transform_indices = @transform_3, window_bounds = array<i64: 1, 8, 128>}]} {
    %c0 = arith.constant 0 : index
    %c0_0 = arith.constant 0 : index
    %0 = vector.load %arg1[%c0, %c0_0] : memref<8x32xf32, #tpu.memory_space<vmem>>, vector<8x32xf32>
    %c0_1 = arith.constant 0 : index
    %c0_2 = arith.constant 0 : index
    %1 = vector.load %arg3[%c0_1, %c0_2] : memref<32x128xf32, #tpu.memory_space<vmem>>, vector<32x128xf32>
    %c0_3 = arith.constant 0 : index
    %c0_4 = arith.constant 0 : index
    %2 = vector.load %arg2[%c0_3, %c0_4] : memref<8x1xi32, #tpu.memory_space<vmem>>, vector<8x1xi32>
    %cst = arith.constant dense<0.000000e+00> : vector<8x128xf32>
    %3 = tpu.matmul %0, %1, %cst {dimension_numbers = #tpu.dot_dimension_numbers<[1], [0], [0], [1], [0, 0, 1, 1], [], []>} : vector<8x32xf32>, vector<32x128xf32>, vector<8x128xf32> -> vector<8x128xf32>
    %4 = tpu.iota {dimensions = array<i32: 1>} : vector<8x128xi32>
    %c4_i32 = arith.constant 4 : i32
    %5 = vector.broadcast %c4_i32 : i32 to vector<8x128xi32>
    %6 = arith.cmpi slt, %4, %5 : vector<8x128xi32>
    %7 = vector.broadcast %2 : vector<8x1xi32> to vector<8x128xi32>
    %8 = arith.cmpi eq, %4, %7 : vector<8x128xi32>
    %cst_5 = arith.constant 0.000000e+00 : f32
    %9 = vector.broadcast %cst_5 : f32 to vector<8x128xf32>
    %10 = arith.select %8, %3, %9 : vector<8x128xi1>, vector<8x128xf32>
    %cst_6 = arith.constant dense<0.000000e+00> : vector<8xf32>
    %11 = vector.multi_reduction <add>, %10, %cst_6 [1] : vector<8x128xf32> to vector<8xf32>
    %12 = vector.shape_cast %11 : vector<8xf32> to vector<8x1xf32>
    %cst_7 = arith.constant 0.000000e+00 : f32
    %13 = vector.broadcast %cst_7 : f32 to vector<8x128xf32>
    %14 = arith.subf %13, %3 : vector<8x128xf32>
    %cst_8 = arith.constant -1.000000e+30 : f32
    %15 = vector.broadcast %cst_8 : f32 to vector<8x128xf32>
    %16 = arith.select %6, %14, %15 : vector<8x128xi1>, vector<8x128xf32>
    %cst_9 = arith.constant dense<0xFF800000> : vector<8xf32>
    %17 = vector.multi_reduction <maximumf>, %16, %cst_9 [1] : vector<8x128xf32> to vector<8xf32>
    %18 = vector.shape_cast %17 : vector<8xf32> to vector<8x1xf32>
    %19 = vector.broadcast %18 : vector<8x1xf32> to vector<8x128xf32>
    %20 = arith.subf %16, %19 : vector<8x128xf32>
    %21 = math.exp %20 : vector<8x128xf32>
    %cst_10 = arith.constant dense<0.000000e+00> : vector<8xf32>
    %22 = vector.multi_reduction <add>, %21, %cst_10 [1] : vector<8x128xf32> to vector<8xf32>
    %23 = vector.shape_cast %22 : vector<8xf32> to vector<8x1xf32>
    %24 = math.log %23 : vector<8x1xf32>
    %25 = arith.addf %24, %18 : vector<8x1xf32>
    %c8_i32 = arith.constant 8 : i32
    %26 = arith.muli %arg0, %c8_i32 : i32
    %27 = tpu.iota {dimensions = array<i32: 0>} : vector<8x1xi32>
    %28 = vector.broadcast %26 : i32 to vector<8x1xi32>
    %29 = arith.addi %28, %27 : vector<8x1xi32>
    %c8_i32_11 = arith.constant 8 : i32
    %30 = vector.broadcast %c8_i32_11 : i32 to vector<8x1xi32>
    %31 = arith.cmpi slt, %29, %30 : vector<8x1xi32>
    %32 = arith.addf %12, %25 : vector<8x1xf32>
    %cst_12 = arith.constant 0.000000e+00 : f32
    %33 = vector.broadcast %cst_12 : f32 to vector<8x1xf32>
    %34 = arith.select %31, %32, %33 : vector<8x1xi1>, vector<8x1xf32>
    %35 = vector.shape_cast %34 : vector<8x1xf32> to vector<1x8x1xf32>
    %cst_13 = arith.constant dense<0.000000e+00> : vector<1xf32>
    %36 = vector.multi_reduction <add>, %35, %cst_13 [1, 2] : vector<1x8x1xf32> to vector<1xf32>
    %37 = vector.shape_cast %36 : vector<1xf32> to vector<1x1x1xf32>
    %38 = vector.extract %37[0, 0, 0] : f32 from vector<1x1x1xf32>
    %39 = vector.broadcast %38 : f32 to vector<1x8x128xf32>
    %c0_14 = arith.constant 0 : index
    %c0_15 = arith.constant 0 : index
    %c0_16 = arith.constant 0 : index
    %40 = vector.load %arg4[%c0_14, %c0_15, %c0_16] : memref<1x8x128xf32, #tpu.memory_space<vmem>>, vector<1x8x128xf32>
    tpu.vector_store %arg4[%c0_14, %c0_15, %c0_16], %39 {strides = array<i32>} : memref<1x8x128xf32, #tpu.memory_space<vmem>>, vector<1x8x128xf32>,
    return
  }
  func.func @transform_0(%arg0: i32) -> (i32, i32) {
    %c0_i32 = arith.constant 0 : i32
    %c0_i32_0 = arith.constant 0 : i32
    return %arg0, %c0_i32 : i32, i32
  }
  func.func @transform_1(%arg0: i32) -> (i32, i32) {
    %c0_i32 = arith.constant 0 : i32
    %c0_i32_0 = arith.constant 0 : i32
    return %arg0, %c0_i32 : i32, i32
  }
  func.func @transform_2(%arg0: i32) -> (i32, i32) {
    %c0_i32 = arith.constant 0 : i32
    %c0_i32_0 = arith.constant 0 : i32
    %c0_i32_1 = arith.constant 0 : i32
    return %c0_i32, %c0_i32_0 : i32, i32
  }
  func.func @transform_3(%arg0: i32) -> (i32, i32, i32) {
    %c0_i32 = arith.constant 0 : i32
    %c0_i32_0 = arith.constant 0 : i32
    %c0_i32_1 = arith.constant 0 : i32
    return %arg0, %c0_i32, %c0_i32_0 : i32, i32, i32
  }
}

</mosaic_0001>

<bundles_post_ra>
// kernel: tpu_custom_call.1
= control target key start
LH: loop header
LB: loop body
LE: loop exit
PB: predicated region body
PF: predicated region fallthrough
CT: control target
= control target key end

     0   :  { %8 = vsyncpa [#allocation3], 0  ;;  %s281_s0 = inlined_call_operand.vmem [shape: f32[8,32], index: 0, kind: input, shape index: {}]   ;;  %s282_s1 = inlined_call_operand.vmem [shape: s32[8,1], index: 1, kind: input, shape index: {}]   ;;  %s283_s2 = inlined_call_operand.hbm [shape: f32[32,128], index: 2, kind: input, shape index: {}]   ;;  %s284_s3 = inlined_call_operand.hbm [shape: f32[1,8,128], index: 3, kind: output, shape index: {}]  }
   0x1   :  { %9 = vsyncpa [#allocation4], 0  ;;  %s242_s12 = smov [#allocation2]  }
   0x2   :  { %s19_s13 = sshll.u32 %s242_s12, 4  ;;  %s20_s13 = int_to_ptr.vmem [resolvable:$true] %s19_s13 }
   0x3   :  { %s206_s14 = scalar_lea.vmem %s20_s13, 512  ;;  %p211_p1 = scmp.lt.s32.totalorder %s20_s13, %s20_s13 }
   0x4   :  { %p207_p0 = scmp.ne.s32.totalorder %s20_s13, %s206_s14  ;;  %p212_p2 = scmp.lt.s32.totalorder %s206_s14, %s206_s14 }
   0x6   :  { %p213_p3 = por %p212_p2, %p211_p1 }
   0x8   :  { %p214_p4 = pnand %p213_p3, %p207_p0 }
   0xa   :  { %217 = shalt.err (!%p214_p4)
}
   0xb   :  { %s243_s15 = smov 128   ;;  %s244_s16 = smov 8  }
   0xc   :  { %25 = dma.hbm_to_vmem [thread:$0]  %s283_s2, 512, %s20_s13, [#allocation3], %s243_s15, %s243_s15, %s244_s16  }
   0xd   :  { %238 = dma.done.wait [#allocation3], 512  }
   0xe   :  { %239 = vsyncadd [#allocation3], 4294966784  ;;  %v245_v0 = vmov 0.0   ;;  %vm246_vm0 = vmmov 0   ;;  %v33_v1 = vld [vmem:[#allocation2 + $0x18] sm:$0xff]  ;;  %v32_v2 = vld [vmem:[#allocation2 + $0x10] sm:$0xff]  ;;  %v109_v7 = vlaneseq }
   0xf   :  { %173 = vmatprep.subr.mxu0 %v245_v0  ;;  %181 = vmatprep.mubr.msk.f32.mxu0 %vm246_vm0, %v245_v0  ;;  %v31_v3 = vld [vmem:[#allocation2 + $0x8] sm:$0xff]  ;;  %v30_v4 = vld [vmem:[#allocation2] sm:$0xff]  ;;  %vm35_vm1 = vcmask 261120   ;;  %v247_v6 = vmov 0   ;;  %vm139_vm4 = vcmask 7168  }
  0x10   :  { %174 = vmatpush3.msra.mxu0 %v33_v1  ;;  %v29_v5 = vld [vmem:[%s281_s0] sm:$0xff]  ;;  %193 = vset.pattern.permute.xlu0 %v247_v6  ;;  %v110_v8 = vand.u32 127, %v109_v7  ;;  %s248_s0 = smov [#allocation5]  }
  0x11   :  { %175 = vmatprep.subr.mxu0 %v245_v0  ;;  %v34_v13 = vld [vmem:[%s282_s1] sm:$0xff]  ;;  %s158_s1 = sshll.u32 %s248_s0, 4  ;;  %s159_s1 = int_to_ptr.vmem [resolvable:$true] %s158_s1 }
  0x12   :  { %176 = vmatpush3.msra.mxu0 %v32_v2  ;;  %vm111_vm2 = vcmp.lt.s32.totalorder %v110_v8, 4  ;;  %s218_s23 = scalar_lea.vmem %s159_s1, 128  ;;  %p223_p6 = scmp.lt.s32.totalorder %s159_s1, %s159_s1 }
  0x13   :  { %177 = vmatprep.subr.mxu0 %v245_v0  ;;  %p219_p5 = scmp.ne.s32.totalorder %s159_s1, %s218_s23  ;;  %p224_p7 = scmp.lt.s32.totalorder %s218_s23, %s218_s23 }
  0x14   :  { %178 = vmatpush3.msra.mxu0 %v31_v3 }
  0x15   :  { %179 = vmatprep.subr.mxu0 %v245_v0  ;;  %p225_p8 = por %p224_p7, %p223_p6 }
  0x16   :  { %180 = vmatpush3.msra.mxu0 %v30_v4 }
  0x17   :  { %182 = vmatmul.mubr.msk.f32.vlgmr.msra.gmra.mxu0 %vm35_vm1, %v29_v5  ;;  %p226_p9 = pnand %p225_p8, %p219_p5 }
  0xd7   :  { %v105_v9 = vpop.f32.mrf.mxu0 }
  0xd8   :  { %v119_v10 = vsub.f32 0.0, %v105_v9 }
  0xd9   :  { %v183_v11 = vpop.f32.mrf.mxu0 }
  0xda   :  { %v120_v12 = vsel %vm111_vm2, %v119_v10, -1e+30 }
  0xdb   :  { %121 = vmax.xlane.f32.xlu0 %v120_v12 }
  0xf1   :  { %113 = vperm.xlu0 %193, %v34_v13  }
 0x164   :  { %v122_v14 = vpop.xlane.xlu0 %121 }
 0x165   :  { %v123_v15 = vsub.f32 %v120_v12, %v122_v14 }
 0x167   :  { %v124_v16 = vmul.f32 1.442695, %v123_v15 }
 0x169   :  { %194 = vpow2.f32 %v124_v16 }
 0x16c   :  { %v114_v17 = vpop.permute.xlu0 %113 }
 0x16d   :  { %vm115_vm3 = vcmp.eq.s32.totalorder %v110_v8, %v114_v17 }
 0x16e   :  { %v116_v19 = vsel %vm115_vm3, %v105_v9, 0.0 }
 0x176   :  { %v195_v18 = vpop.eup %194 }
 0x177   :  { %126 = vadd.xlane.f32.xlu1 %v195_v18 }
 0x17b   :  { %117 = vadd.xlane.f32.xlu1 %v116_v19 }
 0x200   :  { %v127_v20 = vpop.xlane.xlu1 %126 }
 0x201   :  { %196 = vlog2.f32 %v127_v20 }
 0x204   :  { %v118_v24 = vpop.xlane.xlu1 %117 }
 0x20e   :  { %v197_v21 = vpop.eup %196 }
 0x20f   :  { %v129_v22 = vmul.f32 0.6931472, %v197_v21 }
 0x211   :  { %v130_v23 = vadd.f32 %v129_v22, %v122_v14 }
 0x213   :  { %v137_v25 = vadd.f32 %v130_v23, %v118_v24 }
 0x215   :  { %v140_v26 = vsel %vm139_vm4, %v137_v25, 0.0 }
 0x216   :  { %141 = vadd.xlane.f32.xlu1 %v140_v26 }
 0x29f   :  { %v142_v27 = vpop.xlane.xlu1 %141 }
 0x2a0   :  { %v143_v28 = vrot.slane %v142_v27, 4 }
 0x2a2   :  { %v144_v29 = vadd.f32 %v143_v28, %v142_v27 }
 0x2a4   :  { %v145_v30 = vrot.slane %v144_v29, 2 }
 0x2a6   :  { %v146_v31 = vadd.f32 %v145_v30, %v144_v29 }
 0x2a8   :  { %v147_v32 = vrot.slane %v146_v31, 1 }
 0x2aa   :  { %v148_v33 = vadd.f32 %v147_v32, %v146_v31 }
 0x2ac   :  { %184 = vpush %v148_v33 }
 0x2dd   :  { %s185_s22 = spop %184 }
 0x2de   :  { %v150_v34 = vstv %s185_s22 }
 0x2df   :  { %151 = vst [vmem:[#allocation5] sm:$0xff] %v150_v34 }
 0x2e0   :  { %229 = shalt.err (!%p226_p9)
}
 0x2e1   :  { %161 = dma.vmem_to_hbm [thread:$0]  %s159_s1, 128, %s284_s3, [#allocation4]  }
 0x2e2   :  { %240 = dma.done.wait [#allocation4], 128  }
 0x2e3   :  { %241 = vsyncadd [#allocation4], 4294967168 }
 0x2e4   :  { %165 = vsyncpa [#allocation3], 1 }
 0x2e5   :  { %166 = vsyncpa [#allocation4], 1 }

</bundles_post_ra>
